<compile_context>
chip_gen: v5e
topology: v5e:2x2
jax: 0.10.0
libtpu: 0.0.40
codegen_flags: <defaults>
</compile_context>

<pallas_src>
import functools

import jax
import jax.numpy as jnp
from jax.experimental import pallas as pl
from jax.experimental.pallas import tpu as pltpu


def _round_up(x, m):
    return ((x + m - 1) // m) * m


def _choose_tm(n, tm_max=32):
    """>=2 row tiles when possible (v7x megacore), padding < TM, TM in [8, tm_max]."""
    n_tiles = max(2, pl.cdiv(n, tm_max))
    return max(8, min(tm_max, _round_up(pl.cdiv(n, n_tiles), 8)))


# -----------------------------------------------------------------------------
# Fused tail kernel: streaming seq-sum -> modality projections -> cls projection
# -----------------------------------------------------------------------------
def _fused_tail_kernel(lang_ref, img_ref, audio_ref,
                       wl_ref, bl_ref, wi_ref, bi_ref, wa_ref, ba_ref,
                       wcl_ref, wci_ref, wca_ref, bc_ref,
                       proj_ref, lang_o_ref, img_o_ref, audio_o_ref,
                       lang_acc, img_acc,
                       *, seq_len_lang, seq_len_img):
    s = pl.program_id(1)
    n_seq = pl.num_programs(1)

    # ---- init the f32 running seq-sum accumulators on the first seq step ----
    @pl.when(s == 0)
    def _():
        lang_acc[...] = jnp.zeros_like(lang_acc)
        img_acc[...] = jnp.zeros_like(img_acc)

    # ---- streaming seq-sum (XLU reduce over the seq axis of the bf16 block) ----
    lang_acc[...] += jnp.sum(lang_ref[...].astype(jnp.float32), axis=1)   # [TM, Dl]
    img_acc[...] += jnp.sum(img_ref[...].astype(jnp.float32), axis=1)     # [TM, Di]

    # ---- on the last seq step: scale once, then all MXU work + stores ----
    @pl.when(s == n_seq - 1)
    def _():
        # torch.mean(feat, dim=2): single 1/L scale; bf16 cast once for the MXU.
        lang_in = (lang_acc[...] * (1.0 / seq_len_lang)).astype(jnp.bfloat16)
        img_in = (img_acc[...] * (1.0 / seq_len_img)).astype(jnp.bfloat16)
        audio_in = audio_ref[...]                      # bf16; seq len 1 -> mean is identity

        # backbone stand-in projections: bf16 MXU feeds, f32 accumulation
        lang_h = jnp.dot(lang_in, wl_ref[...],
                         preferred_element_type=jnp.float32) + bl_ref[...]     # [TM, Hp]
        img_h = jnp.dot(img_in, wi_ref[...],
                        preferred_element_type=jnp.float32) + bi_ref[...]      # [TM, Hp]
        audio_h = jnp.dot(audio_in, wa_ref[...],
                          preferred_element_type=jnp.float32) + ba_ref[...]    # [TM, Hp]

        # cls_layer('all'): split-weight sum == concat([l,i,a], -1) @ W_cls
        proj = (jnp.dot(lang_h.astype(jnp.bfloat16), wcl_ref[...],
                        preferred_element_type=jnp.float32)
                + jnp.dot(img_h.astype(jnp.bfloat16), wci_ref[...],
                          preferred_element_type=jnp.float32)
                + jnp.dot(audio_h.astype(jnp.bfloat16), wca_ref[...],
                          preferred_element_type=jnp.float32)
                + bc_ref[...])                                                 # [TM, Op]

        proj_ref[...] = proj
        lang_o_ref[...] = lang_h
        img_o_ref[...] = img_h
        audio_o_ref[...] = audio_h


def fused_tail(lang_feat, img_feat, audio_feat, params, hidden_size, output_size,
               tl_max=128):
    """lang_feat [N, Lt, Dl], img_feat [N, Li, Di], audio_feat [N, Da] ->
       (proj [N, O], lang_h [N, H], img_h [N, H], audio_h [N, H])."""
    n, lt, dl = lang_feat.shape
    _, li, di = img_feat.shape
    da = audio_feat.shape[1]
    hp = params["w_lang"].shape[1]      # padded hidden (multiple of 128)
    op = params["w_cls_l"].shape[1]     # padded output (multiple of 128)
    dap = params["w_audio"].shape[0]    # padded audio dim (multiple of 128)

    # ---- bf16 feature feeds: halves HBM traffic; f32 accumulation in-kernel ----
    lang_feat = lang_feat.astype(jnp.bfloat16)
    img_feat = img_feat.astype(jnp.bfloat16)
    audio_feat = audio_feat.astype(jnp.bfloat16)

    # ---- audio lane padding (Da -> multiple of 128; zero rows in w_audio match) ----
    if dap != da:
        audio_feat = jnp.pad(audio_feat, ((0, 0), (0, dap - da)))

    # ---- row tiling: bounded padding, >=2 tiles when possible (v7x megacore) ----
    tm = _choose_tm(n)
    n_pad = _round_up(n, tm)
    if n_pad != n:
        pad = n_pad - n
        lang_feat = jnp.pad(lang_feat, ((0, pad), (0, 0), (0, 0)))
        img_feat = jnp.pad(img_feat, ((0, pad), (0, 0), (0, 0)))
        audio_feat = jnp.pad(audio_feat, ((0, pad), (0, 0)))

    # ---- seq tiling: shared seq grid axis, per-modality tile sizes ----
    n_seq = max(pl.cdiv(lt, tl_max), pl.cdiv(li, tl_max), 1)
    tl_l = _round_up(pl.cdiv(lt, n_seq), 8)
    tl_i = _round_up(pl.cdiv(li, n_seq), 8)
    lt_pad, li_pad = n_seq * tl_l, n_seq * tl_i
    if lt_pad != lt:
        lang_feat = jnp.pad(lang_feat, ((0, 0), (0, lt_pad - lt), (0, 0)))   # zeros: sum unaffected
    if li_pad != li:
        img_feat = jnp.pad(img_feat, ((0, 0), (0, li_pad - li), (0, 0)))

    grid = (n_pad // tm, n_seq)   # rows "parallel", seq (reduction) last, "arbitrary"

    def _resident(shape):
        # Weight / bias tiles: block index is grid-invariant -> stays in VMEM.
        # TODO(synk): pipeline_mode=pl.Buffered(1) at real sizes to single-buffer.
        return pl.BlockSpec(shape, lambda i, s: (0, 0))

    in_specs = [
        pl.BlockSpec((tm, tl_l, dl), lambda i, s: (i, s, 0)),
        pl.BlockSpec((tm, tl_i, di), lambda i, s: (i, s, 0)),
        pl.BlockSpec((tm, dap), lambda i, s: (i, 0)),          # resident across seq axis
        _resident((dl, hp)), _resident((1, hp)),
        _resident((di, hp)), _resident((1, hp)),
        _resident((dap, hp)), _resident((1, hp)),
        _resident((hp, op)), _resident((hp, op)), _resident((hp, op)),
        _resident((1, op)),
    ]
    out_specs = (
        pl.BlockSpec((tm, op), lambda i, s: (i, 0)),
        pl.BlockSpec((tm, hp), lambda i, s: (i, 0)),
        pl.BlockSpec((tm, hp), lambda i, s: (i, 0)),
        pl.BlockSpec((tm, hp), lambda i, s: (i, 0)),
    )
    out_shape = (
        jax.ShapeDtypeStruct((n_pad, op), jnp.float32),
        jax.ShapeDtypeStruct((n_pad, hp), jnp.float32),
        jax.ShapeDtypeStruct((n_pad, hp), jnp.float32),
        jax.ShapeDtypeStruct((n_pad, hp), jnp.float32),
    )
    scratch_shapes = [
        pltpu.VMEM((tm, dl), jnp.float32),    # running lang seq-sum
        pltpu.VMEM((tm, di), jnp.float32),    # running img seq-sum
    ]

    # ---- explicit scoped-VMEM budget: 2x streamed blocks + resident weights + outs ----
    bf16, f32 = 2, 4
    stream_in = 2 * tm * (tl_l * dl + tl_i * di) * bf16 + 2 * tm * dap * bf16
    weights = 2 * sum(int(v.size) * v.dtype.itemsize for v in params.values())
    outs = 2 * tm * (op + 3 * hp) * f32
    scratch = tm * (dl + di) * f32
    vmem_limit = int(min(max((stream_in + weights + outs + scratch) * 3 // 2,
                             32 << 20), 96 << 20))

    kernel = functools.partial(_fused_tail_kernel,
                               seq_len_lang=lt, seq_len_img=li)

    proj_p, lang_p, img_p, audio_p = pl.pallas_call(
        kernel,
        out_shape=out_shape,
        grid=grid,
        in_specs=in_specs,
        out_specs=out_specs,
        scratch_shapes=scratch_shapes,
        compiler_params=pltpu.CompilerParams(
            dimension_semantics=("parallel", "arbitrary"),
            vmem_limit_bytes=vmem_limit),
    )(lang_feat, img_feat, audio_feat,
      params["w_lang"], params["b_lang"],
      params["w_img"], params["b_img"],
      params["w_audio"], params["b_audio"],
      params["w_cls_l"], params["w_cls_i"], params["w_cls_a"], params["b_cls"])

    # Slice off row / lane padding.
    return (proj_p[:n, :output_size],
            lang_p[:n, :hidden_size],
            img_p[:n, :hidden_size],
            audio_p[:n, :hidden_size])


# -----------------------------------------------------------------------------
# DynRT module (synthetic parameters, deterministic init)
# -----------------------------------------------------------------------------
class DynRTPallas:
    def __init__(self, *, lang_dim, img_dim, audio_dim, hidden_size, output_size,
                 seq_tile=128):
        k = jax.random.PRNGKey(0)
        k1, k2, k3, k4 = jax.random.split(k, 4)
        s = 0.02
        hp = _round_up(hidden_size, 128)
        op = _round_up(output_size, 128)
        dap = _round_up(audio_dim, 128)   # lane-dense audio feature dim

        def pad_w(w, rows, cols):
            out = jnp.zeros((rows, cols), jnp.float32)
            return out.at[: w.shape[0], : w.shape[1]].set(w)

        # stand-in backbone projections (see TODO at top of file)
        w_lang = s * jax.random.normal(k1, (lang_dim, hidden_size), jnp.float32)
        w_img = s * jax.random.normal(k2, (img_dim, hidden_size), jnp.float32)
        w_audio = s * jax.random.normal(k3, (audio_dim, hidden_size), jnp.float32)
        # cls_layer_all stand-in: Linear(3*hidden -> output), pre-split per modality
        w_cls = s * jax.random.normal(k4, (3 * hidden_size, output_size), jnp.float32)

        self.params = {
            # weights: zero-padded to lane-dense dims, stored bf16 for the MXU
            "w_lang": pad_w(w_lang, lang_dim, hp).astype(jnp.bfloat16),
            "w_img": pad_w(w_img, img_dim, hp).astype(jnp.bfloat16),
            "w_audio": pad_w(w_audio, dap, hp).astype(jnp.bfloat16),
            "w_cls_l": pad_w(w_cls[:hidden_size], hp, op).astype(jnp.bfloat16),
            "w_cls_i": pad_w(w_cls[hidden_size:2 * hidden_size], hp, op).astype(jnp.bfloat16),
            "w_cls_a": pad_w(w_cls[2 * hidden_size:], hp, op).astype(jnp.bfloat16),
            # biases: f32, zero-padded
            "b_lang": jnp.zeros((1, hp), jnp.float32),
            "b_img": jnp.zeros((1, hp), jnp.float32),
            "b_audio": jnp.zeros((1, hp), jnp.float32),
            "b_cls": jnp.zeros((1, op), jnp.float32),
        }
        self.hidden_size = hidden_size
        self.output_size = output_size
        self.seq_tile = seq_tile

    def __call__(self, img_feat, lang_feat, audio_feat, conversation_mask,
                 missing_mod, x_v_mask, attention_mask, audio_mask):
        B, C = lang_feat.shape[0], lang_feat.shape[1]
        H, O = self.hidden_size, self.output_size

        # --- mask prep (matches the torch unsqueeze glue; masks feed the backbone) ---
        conversation_mask = conversation_mask[:, :, None, None]          # [B, C, 1, 1]
        audio_mask = audio_mask[:, :, None, None]                        # [B, C, 1, 1]
        img_feat_mask = jnp.zeros(
            (img_feat.shape[0], img_feat.shape[1], 1, 1, img_feat.shape[2]),
            dtype=jnp.bool_,
        )
        del conversation_mask, audio_mask, img_feat_mask, missing_mod, x_v_mask, attention_mask
        # TODO(synk): masks are consumed inside DynRT_ED (source unavailable); unused here.

        Lt, Dl = lang_feat.shape[2], lang_feat.shape[3]
        Li, Di = img_feat.shape[2], img_feat.shape[3]
        Da = audio_feat.shape[2]

        proj, lang_h, img_h, audio_h = fused_tail(
            lang_feat.reshape(B * C, Lt, Dl),
            img_feat.reshape(B * C, Li, Di),
            audio_feat.reshape(B * C, Da),
            self.params, H, O, tl_max=self.seq_tile)

        return (proj.reshape(B, C, O),
                lang_h.reshape(B, C, H),
                img_h.reshape(B, C, H),
                audio_h.reshape(B, C, H))


# -----------------------------------------------------------------------------
# Pure-JAX reference for the fused tail (same stand-in params, f32 math)
# -----------------------------------------------------------------------------
def _reference(lang_feat, img_feat, audio_feat, model):
    p = model.params
    H, O = model.hidden_size, model.output_size
    lf = lang_feat.astype(jnp.bfloat16).astype(jnp.float32)
    vf = img_feat.astype(jnp.bfloat16).astype(jnp.float32)
    af = audio_feat.astype(jnp.bfloat16).astype(jnp.float32)
    lm = jnp.mean(lf, axis=2)
    vm = jnp.mean(vf, axis=2)
    wl = p["w_lang"].astype(jnp.float32)[:, :H]
    wi = p["w_img"].astype(jnp.float32)[:, :H]
    wa = p["w_audio"].astype(jnp.float32)[: af.shape[-1], :H]
    lh = lm @ wl
    ih = vm @ wi
    ah = af @ wa
    wcl = p["w_cls_l"].astype(jnp.float32)[:H, :O]
    wci = p["w_cls_i"].astype(jnp.float32)[:H, :O]
    wca = p["w_cls_a"].astype(jnp.float32)[:H, :O]
    proj = lh @ wcl + ih @ wci + ah @ wca
    return proj, lh, ih, ah


# -----------------------------------------------------------------------------
# Example run
# -----------------------------------------------------------------------------
if __name__ == "__main__":
    B = 4            # batch size
    C = 4            # max_conversation_len
    Lt = 16          # max text length          (stand-in for 768-token analogue)
    Li = 16          # image patches            (stand-in for 49)
    Dl = 32          # text feature dim         (stand-in for 768)
    Di = 32          # image feature dim        (stand-in for 768)
    Da = 64          # audio feature dim        (stand-in for 6373)
    H = 32           # hidden_size
    O = 8            # output_size

    key = jax.random.PRNGKey(0)
    k_img, k_lang, k_aud = jax.random.split(key, 3)
    img_feat = jax.random.normal(k_img, (B, C, Li, Di), jnp.float32)
    lang_feat = jax.random.normal(k_lang, (B, C, Lt, Dl), jnp.float32)
    audio_feat = jax.random.normal(k_aud, (B, C, Da), jnp.float32)

    conversation_mask = jnp.ones((B, C), jnp.float32)
    missing_mod = jnp.zeros((B, C), jnp.int32)
    x_v_mask = jnp.ones((B, C), jnp.float32)
    attention_mask = jnp.ones((B, C, Lt), jnp.float32)
    audio_mask = jnp.ones((B, C), jnp.float32)

    # seq_tile=8 so the demo exercises the multi-step seq accumulator + 2 row tiles.
    model = DynRTPallas(lang_dim=Dl, img_dim=Di, audio_dim=Da,
                        hidden_size=H, output_size=O, seq_tile=8)

    proj_feat, lang_out, img_out, audio_out = model(
        img_feat, lang_feat, audio_feat, conversation_mask,
        missing_mod, x_v_mask, attention_mask, audio_mask)

    jax.block_until_ready((proj_feat, lang_out, img_out, audio_out))
    assert proj_feat.shape == (B, C, O)
    assert lang_out.shape == (B, C, H)
    assert img_out.shape == (B, C, H)
    assert audio_out.shape == (B, C, H)

    # correctness vs pure-JAX reference (bf16 MXU feeds -> loose-ish tolerance)
    ref_proj, ref_l, ref_i, ref_a = _reference(lang_feat, img_feat, audio_feat, model)
    assert jnp.allclose(proj_feat.reshape(B * C, O), ref_proj.reshape(B * C, O),
                        atol=2e-3, rtol=5e-2)
    assert jnp.allclose(lang_out.reshape(B * C, H), ref_l.reshape(B * C, H),
                        atol=2e-3, rtol=5e-2)
    assert jnp.allclose(img_out.reshape(B * C, H), ref_i.reshape(B * C, H),
                        atol=2e-3, rtol=5e-2)
    assert jnp.allclose(audio_out.reshape(B * C, H), ref_a.reshape(B * C, H),
                        atol=2e-3, rtol=5e-2)

    print("KERNEL_OK")
</pallas_src>

<mosaic_0001>
module attributes {stable_mosaic.version = 11 : i64} {
  func.func @_fused_tail_kernel(%arg0: i32, %arg1: i32, %arg2: memref<8x8x32xbf16, #tpu.memory_space<vmem>>, %arg3: memref<8x8x32xbf16, #tpu.memory_space<vmem>>, %arg4: memref<8x128xbf16, #tpu.memory_space<vmem>>, %arg5: memref<32x128xbf16, #tpu.memory_space<vmem>>, %arg6: memref<1x128xf32, #tpu.memory_space<vmem>>, %arg7: memref<32x128xbf16, #tpu.memory_space<vmem>>, %arg8: memref<1x128xf32, #tpu.memory_space<vmem>>, %arg9: memref<128x128xbf16, #tpu.memory_space<vmem>>, %arg10: memref<1x128xf32, #tpu.memory_space<vmem>>, %arg11: memref<128x128xbf16, #tpu.memory_space<vmem>>, %arg12: memref<128x128xbf16, #tpu.memory_space<vmem>>, %arg13: memref<128x128xbf16, #tpu.memory_space<vmem>>, %arg14: memref<1x128xf32, #tpu.memory_space<vmem>>, %arg15: memref<8x128xf32, #tpu.memory_space<vmem>>, %arg16: memref<8x128xf32, #tpu.memory_space<vmem>>, %arg17: memref<8x128xf32, #tpu.memory_space<vmem>>, %arg18: memref<8x128xf32, #tpu.memory_space<vmem>>, %arg19: memref<8x32xf32, #tpu.memory_space<vmem>>, %arg20: memref<8x32xf32, #tpu.memory_space<vmem>>) attributes {dimension_semantics = [#tpu.dimension_semantics<parallel>, #tpu.dimension_semantics<arbitrary>], iteration_bounds = array<i64: 2, 2>, scalar_prefetch = 0 : i64, scratch_operands = 2 : i64, tpu.core_type = #tpu.core_type<tc>, window_params = [{transform_indices = @transform_0, window_bounds = array<i64: 8, 8, 32>}, {transform_indices = @transform_1, window_bounds = array<i64: 8, 8, 32>}, {transform_indices = @transform_2, window_bounds = array<i64: 8, 128>}, {pipeline_mode = #tpu.pipeline_mode<synchronous>, transform_indices = @transform_3, window_bounds = array<i64: 32, 128>}, {pipeline_mode = #tpu.pipeline_mode<synchronous>, transform_indices = @transform_4, window_bounds = array<i64: 1, 128>}, {pipeline_mode = #tpu.pipeline_mode<synchronous>, transform_indices = @transform_5, window_bounds = array<i64: 32, 128>}, {pipeline_mode = #tpu.pipeline_mode<synchronous>, transform_indices = @transform_6, window_bounds = array<i64: 1, 128>}, {pipeline_mode = #tpu.pipeline_mode<synchronous>, transform_indices = @transform_7, window_bounds = array<i64: 128, 128>}, {pipeline_mode = #tpu.pipeline_mode<synchronous>, transform_indices = @transform_8, window_bounds = array<i64: 1, 128>}, {pipeline_mode = #tpu.pipeline_mode<synchronous>, transform_indices = @transform_9, window_bounds = array<i64: 128, 128>}, {pipeline_mode = #tpu.pipeline_mode<synchronous>, transform_indices = @transform_10, window_bounds = array<i64: 128, 128>}, {pipeline_mode = #tpu.pipeline_mode<synchronous>, transform_indices = @transform_11, window_bounds = array<i64: 128, 128>}, {pipeline_mode = #tpu.pipeline_mode<synchronous>, transform_indices = @transform_12, window_bounds = array<i64: 1, 128>}, {transform_indices = @transform_13, window_bounds = array<i64: 8, 128>}, {transform_indices = @transform_14, window_bounds = array<i64: 8, 128>}, {transform_indices = @transform_15, window_bounds = array<i64: 8, 128>}, {transform_indices = @transform_16, window_bounds = array<i64: 8, 128>}]} {
    %c0_i32 = arith.constant 0 : i32
    %0 = arith.cmpi eq, %arg1, %c0_i32 : i32
    %1 = arith.extui %0 : i1 to i32
    %c0_i32_0 = arith.constant 0 : i32
    %2 = arith.cmpi ne, %1, %c0_i32_0 : i32
    scf.if %2 {
      %cst_16 = arith.constant 0.000000e+00 : f32
      %18 = vector.broadcast %cst_16 : f32 to vector<8x32xf32>
      %c0_17 = arith.constant 0 : index
      %c0_18 = arith.constant 0 : index
      %19 = vector.load %arg19[%c0_17, %c0_18] : memref<8x32xf32, #tpu.memory_space<vmem>>, vector<8x32xf32>
      tpu.vector_store %arg19[%c0_17, %c0_18], %18 {strides = array<i32>} : memref<8x32xf32, #tpu.memory_space<vmem>>, vector<8x32xf32>,
      %cst_19 = arith.constant 0.000000e+00 : f32
      %20 = vector.broadcast %cst_19 : f32 to vector<8x32xf32>
      %c0_20 = arith.constant 0 : index
      %c0_21 = arith.constant 0 : index
      %21 = vector.load %arg20[%c0_20, %c0_21] : memref<8x32xf32, #tpu.memory_space<vmem>>, vector<8x32xf32>
      tpu.vector_store %arg20[%c0_20, %c0_21], %20 {strides = array<i32>} : memref<8x32xf32, #tpu.memory_space<vmem>>, vector<8x32xf32>,
    } else {
    }
    %c0 = arith.constant 0 : index
    %c0_1 = arith.constant 0 : index
    %3 = vector.load %arg19[%c0, %c0_1] : memref<8x32xf32, #tpu.memory_space<vmem>>, vector<8x32xf32>
    %c0_2 = arith.constant 0 : index
    %c0_3 = arith.constant 0 : index
    %c0_4 = arith.constant 0 : index
    %4 = vector.load %arg2[%c0_2, %c0_3, %c0_4] : memref<8x8x32xbf16, #tpu.memory_space<vmem>>, vector<8x8x32xbf16>
    %5 = arith.extf %4 : vector<8x8x32xbf16> to vector<8x8x32xf32>
    %cst = arith.constant dense<0.000000e+00> : vector<8x32xf32>
    %6 = vector.multi_reduction <add>, %5, %cst [1] : vector<8x8x32xf32> to vector<8x32xf32>
    %7 = arith.addf %3, %6 : vector<8x32xf32>
    %c0_5 = arith.constant 0 : index
    %c0_6 = arith.constant 0 : index
    %8 = vector.load %arg19[%c0_5, %c0_6] : memref<8x32xf32, #tpu.memory_space<vmem>>, vector<8x32xf32>
    tpu.vector_store %arg19[%c0_5, %c0_6], %7 {strides = array<i32>} : memref<8x32xf32, #tpu.memory_space<vmem>>, vector<8x32xf32>,
    %c0_7 = arith.constant 0 : index
    %c0_8 = arith.constant 0 : index
    %9 = vector.load %arg20[%c0_7, %c0_8] : memref<8x32xf32, #tpu.memory_space<vmem>>, vector<8x32xf32>
    %c0_9 = arith.constant 0 : index
    %c0_10 = arith.constant 0 : index
    %c0_11 = arith.constant 0 : index
    %10 = vector.load %arg3[%c0_9, %c0_10, %c0_11] : memref<8x8x32xbf16, #tpu.memory_space<vmem>>, vector<8x8x32xbf16>
    %11 = arith.extf %10 : vector<8x8x32xbf16> to vector<8x8x32xf32>
    %cst_12 = arith.constant dense<0.000000e+00> : vector<8x32xf32>
    %12 = vector.multi_reduction <add>, %11, %cst_12 [1] : vector<8x8x32xf32> to vector<8x32xf32>
    %13 = arith.addf %9, %12 : vector<8x32xf32>
    %c0_13 = arith.constant 0 : index
    %c0_14 = arith.constant 0 : index
    %14 = vector.load %arg20[%c0_13, %c0_14] : memref<8x32xf32, #tpu.memory_space<vmem>>, vector<8x32xf32>
    tpu.vector_store %arg20[%c0_13, %c0_14], %13 {strides = array<i32>} : memref<8x32xf32, #tpu.memory_space<vmem>>, vector<8x32xf32>,
    %c1_i32 = arith.constant 1 : i32
    %15 = arith.cmpi eq, %arg1, %c1_i32 : i32
    %16 = arith.extui %15 : i1 to i32
    %c0_i32_15 = arith.constant 0 : i32
    %17 = arith.cmpi ne, %16, %c0_i32_15 : i32
    scf.if %17 {
      %c0_16 = arith.constant 0 : index
      %c0_17 = arith.constant 0 : index
      %18 = vector.load %arg19[%c0_16, %c0_17] : memref<8x32xf32, #tpu.memory_space<vmem>>, vector<8x32xf32>
      %cst_18 = arith.constant 6.250000e-02 : f32
      %19 = vector.broadcast %cst_18 : f32 to vector<8x32xf32>
      %20 = arith.mulf %18, %19 : vector<8x32xf32>
      %21 = arith.truncf %20 : vector<8x32xf32> to vector<8x32xbf16>
      %c0_19 = arith.constant 0 : index
      %c0_20 = arith.constant 0 : index
      %22 = vector.load %arg20[%c0_19, %c0_20] : memref<8x32xf32, #tpu.memory_space<vmem>>, vector<8x32xf32>
      %cst_21 = arith.constant 6.250000e-02 : f32
      %23 = vector.broadcast %cst_21 : f32 to vector<8x32xf32>
      %24 = arith.mulf %22, %23 : vector<8x32xf32>
      %25 = arith.truncf %24 : vector<8x32xf32> to vector<8x32xbf16>
      %c0_22 = arith.constant 0 : index
      %c0_23 = arith.constant 0 : index
      %26 = vector.load %arg4[%c0_22, %c0_23] : memref<8x128xbf16, #tpu.memory_space<vmem>>, vector<8x128xbf16>
      %c0_24 = arith.constant 0 : index
      %c0_25 = arith.constant 0 : index
      %27 = vector.load %arg5[%c0_24, %c0_25] : memref<32x128xbf16, #tpu.memory_space<vmem>>, vector<32x128xbf16>
      %cst_26 = arith.constant dense<0.000000e+00> : vector<8x128xf32>
      %28 = tpu.matmul %21, %27, %cst_26 {dimension_numbers = #tpu.dot_dimension_numbers<[1], [0], [0], [1], [0, 0, 1, 1], [], []>} : vector<8x32xbf16>, vector<32x128xbf16>, vector<8x128xf32> -> vector<8x128xf32>
      %c0_27 = arith.constant 0 : index
      %c0_28 = arith.constant 0 : index
      %29 = vector.load %arg6[%c0_27, %c0_28] : memref<1x128xf32, #tpu.memory_space<vmem>>, vector<1x128xf32>
      %30 = vector.broadcast %29 : vector<1x128xf32> to vector<8x128xf32>
      %31 = arith.addf %28, %30 : vector<8x128xf32>
      %c0_29 = arith.constant 0 : index
      %c0_30 = arith.constant 0 : index
      %32 = vector.load %arg7[%c0_29, %c0_30] : memref<32x128xbf16, #tpu.memory_space<vmem>>, vector<32x128xbf16>
      %cst_31 = arith.constant dense<0.000000e+00> : vector<8x128xf32>
      %33 = tpu.matmul %25, %32, %cst_31 {dimension_numbers = #tpu.dot_dimension_numbers<[1], [0], [0], [1], [0, 0, 1, 1], [], []>} : vector<8x32xbf16>, vector<32x128xbf16>, vector<8x128xf32> -> vector<8x128xf32>
      %c0_32 = arith.constant 0 : index
      %c0_33 = arith.constant 0 : index
      %34 = vector.load %arg8[%c0_32, %c0_33] : memref<1x128xf32, #tpu.memory_space<vmem>>, vector<1x128xf32>
      %35 = vector.broadcast %34 : vector<1x128xf32> to vector<8x128xf32>
      %36 = arith.addf %33, %35 : vector<8x128xf32>
      %c0_34 = arith.constant 0 : index
      %c0_35 = arith.constant 0 : index
      %37 = vector.load %arg9[%c0_34, %c0_35] : memref<128x128xbf16, #tpu.memory_space<vmem>>, vector<128x128xbf16>
      %cst_36 = arith.constant dense<0.000000e+00> : vector<8x128xf32>
      %38 = tpu.matmul %26, %37, %cst_36 {dimension_numbers = #tpu.dot_dimension_numbers<[1], [0], [0], [1], [0, 0, 1, 1], [], []>} : vector<8x128xbf16>, vector<128x128xbf16>, vector<8x128xf32> -> vector<8x128xf32>
      %c0_37 = arith.constant 0 : index
      %c0_38 = arith.constant 0 : index
      %39 = vector.load %arg10[%c0_37, %c0_38] : memref<1x128xf32, #tpu.memory_space<vmem>>, vector<1x128xf32>
      %40 = vector.broadcast %39 : vector<1x128xf32> to vector<8x128xf32>
      %41 = arith.addf %38, %40 : vector<8x128xf32>
      %42 = arith.truncf %31 : vector<8x128xf32> to vector<8x128xbf16>
      %c0_39 = arith.constant 0 : index
      %c0_40 = arith.constant 0 : index
      %43 = vector.load %arg11[%c0_39, %c0_40] : memref<128x128xbf16, #tpu.memory_space<vmem>>, vector<128x128xbf16>
      %cst_41 = arith.constant dense<0.000000e+00> : vector<8x128xf32>
      %44 = tpu.matmul %42, %43, %cst_41 {dimension_numbers = #tpu.dot_dimension_numbers<[1], [0], [0], [1], [0, 0, 1, 1], [], []>} : vector<8x128xbf16>, vector<128x128xbf16>, vector<8x128xf32> -> vector<8x128xf32>
      %45 = arith.truncf %36 : vector<8x128xf32> to vector<8x128xbf16>
      %c0_42 = arith.constant 0 : index
      %c0_43 = arith.constant 0 : index
      %46 = vector.load %arg12[%c0_42, %c0_43] : memref<128x128xbf16, #tpu.memory_space<vmem>>, vector<128x128xbf16>
      %cst_44 = arith.constant dense<0.000000e+00> : vector<8x128xf32>
      %47 = tpu.matmul %45, %46, %cst_44 {dimension_numbers = #tpu.dot_dimension_numbers<[1], [0], [0], [1], [0, 0, 1, 1], [], []>} : vector<8x128xbf16>, vector<128x128xbf16>, vector<8x128xf32> -> vector<8x128xf32>
      %48 = arith.addf %44, %47 : vector<8x128xf32>
      %49 = arith.truncf %41 : vector<8x128xf32> to vector<8x128xbf16>
      %c0_45 = arith.constant 0 : index
      %c0_46 = arith.constant 0 : index
      %50 = vector.load %arg13[%c0_45, %c0_46] : memref<128x128xbf16, #tpu.memory_space<vmem>>, vector<128x128xbf16>
      %cst_47 = arith.constant dense<0.000000e+00> : vector<8x128xf32>
      %51 = tpu.matmul %49, %50, %cst_47 {dimension_numbers = #tpu.dot_dimension_numbers<[1], [0], [0], [1], [0, 0, 1, 1], [], []>} : vector<8x128xbf16>, vector<128x128xbf16>, vector<8x128xf32> -> vector<8x128xf32>
      %52 = arith.addf %48, %51 : vector<8x128xf32>
      %c0_48 = arith.constant 0 : index
      %c0_49 = arith.constant 0 : index
      %53 = vector.load %arg14[%c0_48, %c0_49] : memref<1x128xf32, #tpu.memory_space<vmem>>, vector<1x128xf32>
      %54 = vector.broadcast %53 : vector<1x128xf32> to vector<8x128xf32>
      %55 = arith.addf %52, %54 : vector<8x128xf32>
      %c0_50 = arith.constant 0 : index
      %c0_51 = arith.constant 0 : index
      %56 = vector.load %arg15[%c0_50, %c0_51] : memref<8x128xf32, #tpu.memory_space<vmem>>, vector<8x128xf32>
      tpu.vector_store %arg15[%c0_50, %c0_51], %55 {strides = array<i32>} : memref<8x128xf32, #tpu.memory_space<vmem>>, vector<8x128xf32>,
      %c0_52 = arith.constant 0 : index
      %c0_53 = arith.constant 0 : index
      %57 = vector.load %arg16[%c0_52, %c0_53] : memref<8x128xf32, #tpu.memory_space<vmem>>, vector<8x128xf32>
      tpu.vector_store %arg16[%c0_52, %c0_53], %31 {strides = array<i32>} : memref<8x128xf32, #tpu.memory_space<vmem>>, vector<8x128xf32>,
      %c0_54 = arith.constant 0 : index
      %c0_55 = arith.constant 0 : index
      %58 = vector.load %arg17[%c0_54, %c0_55] : memref<8x128xf32, #tpu.memory_space<vmem>>, vector<8x128xf32>
      tpu.vector_store %arg17[%c0_54, %c0_55], %36 {strides = array<i32>} : memref<8x128xf32, #tpu.memory_space<vmem>>, vector<8x128xf32>,
      %c0_56 = arith.constant 0 : index
      %c0_57 = arith.constant 0 : index
      %59 = vector.load %arg18[%c0_56, %c0_57] : memref<8x128xf32, #tpu.memory_space<vmem>>, vector<8x128xf32>
      tpu.vector_store %arg18[%c0_56, %c0_57], %41 {strides = array<i32>} : memref<8x128xf32, #tpu.memory_space<vmem>>, vector<8x128xf32>,
    } else {
    }
    return
  }
  func.func @transform_0(%arg0: i32, %arg1: i32) -> (i32, i32, i32) {
    %c0_i32 = arith.constant 0 : i32
    %c0_i32_0 = arith.constant 0 : i32
    return %arg0, %arg1, %c0_i32 : i32, i32, i32
  }
  func.func @transform_1(%arg0: i32, %arg1: i32) -> (i32, i32, i32) {
    %c0_i32 = arith.constant 0 : i32
    %c0_i32_0 = arith.constant 0 : i32
    return %arg0, %arg1, %c0_i32 : i32, i32, i32
  }
  func.func @transform_2(%arg0: i32, %arg1: i32) -> (i32, i32) {
    %c0_i32 = arith.constant 0 : i32
    %c0_i32_0 = arith.constant 0 : i32
    return %arg0, %c0_i32 : i32, i32
  }
  func.func @transform_3(%arg0: i32, %arg1: i32) -> (i32, i32) {
    %c0_i32 = arith.constant 0 : i32
    %c0_i32_0 = arith.constant 0 : i32
    %c0_i32_1 = arith.constant 0 : i32
    return %c0_i32, %c0_i32_0 : i32, i32
  }
  func.func @transform_4(%arg0: i32, %arg1: i32) -> (i32, i32) {
    %c0_i32 = arith.constant 0 : i32
    %c0_i32_0 = arith.constant 0 : i32
    %c0_i32_1 = arith.constant 0 : i32
    return %c0_i32, %c0_i32_0 : i32, i32
  }
  func.func @transform_5(%arg0: i32, %arg1: i32) -> (i32, i32) {
    %c0_i32 = arith.constant 0 : i32
    %c0_i32_0 = arith.constant 0 : i32
    %c0_i32_1 = arith.constant 0 : i32
    return %c0_i32, %c0_i32_0 : i32, i32
  }
  func.func @transform_6(%arg0: i32, %arg1: i32) -> (i32, i32) {
    %c0_i32 = arith.constant 0 : i32
    %c0_i32_0 = arith.constant 0 : i32
    %c0_i32_1 = arith.constant 0 : i32
    return %c0_i32, %c0_i32_0 : i32, i32
  }
  func.func @transform_7(%arg0: i32, %arg1: i32) -> (i32, i32) {
    %c0_i32 = arith.constant 0 : i32
    %c0_i32_0 = arith.constant 0 : i32
    %c0_i32_1 = arith.constant 0 : i32
    return %c0_i32, %c0_i32_0 : i32, i32
  }
  func.func @transform_8(%arg0: i32, %arg1: i32) -> (i32, i32) {
    %c0_i32 = arith.constant 0 : i32
    %c0_i32_0 = arith.constant 0 : i32
    %c0_i32_1 = arith.constant 0 : i32
    return %c0_i32, %c0_i32_0 : i32, i32
  }
  func.func @transform_9(%arg0: i32, %arg1: i32) -> (i32, i32) {
    %c0_i32 = arith.constant 0 : i32
    %c0_i32_0 = arith.constant 0 : i32
    %c0_i32_1 = arith.constant 0 : i32
    return %c0_i32, %c0_i32_0 : i32, i32
  }
  func.func @transform_10(%arg0: i32, %arg1: i32) -> (i32, i32) {
    %c0_i32 = arith.constant 0 : i32
    %c0_i32_0 = arith.constant 0 : i32
    %c0_i32_1 = arith.constant 0 : i32
    return %c0_i32, %c0_i32_0 : i32, i32
  }
  func.func @transform_11(%arg0: i32, %arg1: i32) -> (i32, i32) {
    %c0_i32 = arith.constant 0 : i32
    %c0_i32_0 = arith.constant 0 : i32
    %c0_i32_1 = arith.constant 0 : i32
    return %c0_i32, %c0_i32_0 : i32, i32
  }
  func.func @transform_12(%arg0: i32, %arg1: i32) -> (i32, i32) {
    %c0_i32 = arith.constant 0 : i32
    %c0_i32_0 = arith.constant 0 : i32
    %c0_i32_1 = arith.constant 0 : i32
    return %c0_i32, %c0_i32_0 : i32, i32
  }
  func.func @transform_13(%arg0: i32, %arg1: i32) -> (i32, i32) {
    %c0_i32 = arith.constant 0 : i32
    %c0_i32_0 = arith.constant 0 : i32
    return %arg0, %c0_i32 : i32, i32
  }
  func.func @transform_14(%arg0: i32, %arg1: i32) -> (i32, i32) {
    %c0_i32 = arith.constant 0 : i32
    %c0_i32_0 = arith.constant 0 : i32
    return %arg0, %c0_i32 : i32, i32
  }
  func.func @transform_15(%arg0: i32, %arg1: i32) -> (i32, i32) {
    %c0_i32 = arith.constant 0 : i32
    %c0_i32_0 = arith.constant 0 : i32
    return %arg0, %c0_i32 : i32, i32
  }
  func.func @transform_16(%arg0: i32, %arg1: i32) -> (i32, i32) {
    %c0_i32 = arith.constant 0 : i32
    %c0_i32_0 = arith.constant 0 : i32
    return %arg0, %c0_i32 : i32, i32
  }
}

</mosaic_0001>

<bundles_post_ra>
// kernel: tpu_custom_call.1
= control target key start
LH: loop header
LB: loop body
LE: loop exit
PB: predicated region body
PF: predicated region fallthrough
CT: control target
= control target key end

     0   :  { %s3260_s0 = inlined_call_operand.hbm [shape: bf16[16,16,32], index: 0, kind: input, shape index: {}]   ;;  %s3261_s1 = inlined_call_operand.hbm [shape: bf16[16,16,32], index: 1, kind: input, shape index: {}]   ;;  %s3262_s2 = inlined_call_operand.hbm [shape: bf16[16,128], index: 2, kind: input, shape index: {}]   ;;  %s3263_s3 = inlined_call_operand.hbm [shape: bf16[32,128], index: 3, kind: input, shape index: {}]   ;;  %s3264_s4 = inlined_call_operand.vmem [shape: f32[1,128], index: 4, kind: input, shape index: {}]   ;;  %s3265_s5 = inlined_call_operand.hbm [shape: bf16[32,128], index: 5, kind: input, shape index: {}]   ;;  %s3266_s6 = inlined_call_operand.vmem [shape: f32[1,128], index: 6, kind: input, shape index: {}]   ;;  %s3267_s7 = inlined_call_operand.hbm [shape: bf16[128,128], index: 7, kind: input, shape index: {}]   ;;  %s3268_s8 = inlined_call_operand.vmem [shape: f32[1,128], index: 8, kind: input, shape index: {}]   ;;  %s3269_s9 = inlined_call_operand.hbm [shape: bf16[128,128], index: 9, kind: input, shape index: {}]   ;;  %s3270_s10 = inlined_call_operand.hbm [shape: bf16[128,128], index: 10, kind: input, shape index: {}]   ;;  %s3271_s11 = inlined_call_operand.hbm [shape: bf16[128,128], index: 11, kind: input, shape index: {}]   ;;  %s3272_s12 = inlined_call_operand.vmem [shape: f32[1,128], index: 12, kind: input, shape index: {}]   ;;  %s3273_s13 = inlined_call_operand.hbm [shape: f32[16,128], index: 13, kind: output, shape index: {0}]   ;;  %s3274_s14 = inlined_call_operand.hbm [shape: f32[16,128], index: 14, kind: output, shape index: {1}]   ;;  %s3275_s15 = inlined_call_operand.hbm [shape: f32[16,128], index: 15, kind: output, shape index: {2}]   ;;  %s3276_s16 = inlined_call_operand.hbm [shape: f32[16,128], index: 16, kind: output, shape index: {3}]  }
   0x1   :  { %3299 = sst [smem:[#allocation43_spill]] %s3260_s0 }
   0x2   :  { %3300 = sst [smem:[#allocation44_spill]] %s3261_s1 }
   0x3   :  { %3301 = sst [smem:[#allocation45_spill]] %s3262_s2 }
   0x4   :  { %3302 = sst [smem:[#allocation46_spill]] %s3263_s3 }
   0x5   :  { %3303 = sst [smem:[#allocation47_spill]] %s3264_s4 }
   0x6   :  { %3304 = sst [smem:[#allocation48_spill]] %s3265_s5 }
   0x7   :  { %3305 = sst [smem:[#allocation49_spill]] %s3266_s6 }
   0x8   :  { %3306 = sst [smem:[#allocation50_spill]] %s3267_s7 }
   0x9   :  { %3307 = sst [smem:[#allocation51_spill]] %s3268_s8 }
   0xa   :  { %3308 = sst [smem:[#allocation52_spill]] %s3269_s9 }
   0xb   :  { %3309 = sst [smem:[#allocation53_spill]] %s3270_s10 }
   0xc   :  { %3310 = sst [smem:[#allocation54_spill]] %s3272_s12 }
   0xd   :  { %3311 = sst [smem:[#allocation55_spill]] %s3273_s13 }
   0xe   :  { %3312 = sst [smem:[#allocation56_spill]] %s3274_s14 }
   0xf   :  { %3313 = sst [smem:[#allocation57_spill]] %s3275_s15 }
  0x10   :  { %3314 = sst [smem:[#allocation58_spill]] %s3276_s16 }
  0x11   :  { %22 = vsyncpa [#allocation5], 0 }
  0x12   :  { %24 = vsyncpa [#allocation5 + $0x1], 0 }
  0x13   :  { %25 = vsyncpa [#allocation8], 0 }
  0x14   :  { %27 = vsyncpa [#allocation8 + $0x1], 0 }
  0x15   :  { %28 = vsyncpa [#allocation11], 0 }
  0x16   :  { %29 = vsyncpa [#allocation14], 0 }
  0x17   :  { %30 = vsyncpa [#allocation17], 0 }
  0x18   :  { %31 = vsyncpa [#allocation6], 0 }
  0x19   :  { %33 = vsyncpa [#allocation6 + $0x1], 0 }
  0x1a   :  { %34 = vsyncpa [#allocation21], 0 }
  0x1b   :  { %36 = vsyncpa [#allocation21 + $0x1], 0 }
  0x1c   :  { %37 = vsyncpa [#allocation24], 0 }
  0x1d   :  { %39 = vsyncpa [#allocation24 + $0x1], 0  ;;  %s2794_s21 = smov 0   ;;  %s2796_s22 = smov 0  }
  0x1e   :  { %s2798_s23 = smov 0   ;;  %s2800_s24 = smov 0  }
  0x1f   :  { %s2802_s25 = smov 0   ;;  %s2804_s26 = smov 0  }
  0x20   :  { %s2806_s27 = smov 0   ;;  %s2808_s28 = smov 0  }
  0x21   :  { %s2810_s29 = smov 0   ;;  %s2812_s30 = smov 0  }
  0x22   :  { %s2814_s0 = smov 0  }
  0x23 LB: > { %3315 = sst [smem:[#allocation34_spill]] %s2673_s25  ;;  %s2850_s17 = sadd.s32 4294967295, %s2697_s0   ;;  %s2697_s0 = sphi %s2814_s0, %s45_s0   ;;  %s2693_s30 = sphi %s2812_s30, %s3375_s30   ;;  %s2689_s29 = sphi %s2810_s29, %s3367_s29   ;;  %s2685_s28 = sphi %s2808_s28, %s3374_s28   ;;  %s2681_s27 = sphi %s2806_s27, %s3366_s27   ;;  %s2677_s26 = sphi %s2804_s26, %s3373_s26   ;;  %s2673_s25 = sphi %s2802_s25, %s3372_s25   ;;  %s2669_s24 = sphi %s2800_s24, %s3364_s24   ;;  %s2665_s23 = sphi %s2798_s23, %s3371_s23   ;;  %s2661_s22 = sphi %s2796_s22, %s3370_s22   ;;  %s2657_s21 = sphi %s2794_s21, %s3369_s21  }
  0x24   : > { %3316 = sst [smem:[#allocation35_spill]] %s2681_s27  ;;  %p1731_p0 = scmp.ge.s32.totalorder %s2697_s0, 1 }
  0x25   : > { %3317 = sst [smem:[#allocation36_spill]] %s2685_s28  ;;  %p80_p1 = scmp.eq.s32.totalorder %s2850_s17, 0 }
  0x26   : > { %3318 = sst [smem:[#allocation37_spill]] %s2689_s29  ;;  %p458_p2 = scmp.lt.s32.totalorder %s2697_s0, 5 }
  0x27   : > { %s3319_s3 = sld [smem:[#allocation46_spill]]  ;;  %s2699_s15 = smov [#allocation10]  }
  0x28   : > { %p2858_p3 = pnand %p1731_p0, %p458_p2  ;;  %s471_s13 = sshll.u32 %s2699_s15, 4  ;;  %s472_s13 = int_to_ptr.vmem [resolvable:$true] %s471_s13 }
  0x29   : > { %s3323_s7 = sld [smem:[#allocation50_spill]]  ;;  %s3281_s19 = smov 64  }
  0x2a   : > { %s3320_s16 = scalar_select %p2858_p3, 1, 0 }
  0x2b   : > { %p2035_p4 = pneg %p2858_p3  ;;  %s2702_s15 = smov [#allocation13]  }
  0x2c   : > { %3321 = sst [smem:[#allocation38_spill]] %s3320_s16  ;;  %s505_s12 = sshll.u32 %s2702_s15, 4  ;;  %s506_s12 = int_to_ptr.vmem [resolvable:$true] %s505_s12 }
  0x2d   : > { %s469_s20 = sshll.u32 %s3319_s3, 4  ;;  %p2866_p5 = pnand %p2035_p4, %p80_p1  ;;  %s470_s20 = int_to_ptr.hbm [resolvable:$true] %s469_s20 }
  0x2e   : > { %s3283_s3 = smov 4   ;;  %s3324_s10 = sld [smem:[#allocation53_spill]] }
  0x2f   : > { %s503_s18 = sshll.u32 %s3323_s7, 4  ;;  %s54_s8 = sadd.s32 1, %s2689_s29  ;;  %s504_s18 = int_to_ptr.hbm [resolvable:$true] %s503_s18 }
  0x30   : > { %2038 = dma.hbm_to_vmem [thread:$0]  (!%p2866_p5), %s470_s20, 256, %s472_s13, [#allocation11], %s3281_s19, %s3281_s19, %s3283_s3  }
  0x31   : > { %2044 = dma.hbm_to_vmem [thread:$0]  (!%p2866_p5), %s504_s18, 1024, %s506_s12, [#allocation14], %s3281_s19, %s3281_s19, %s3283_s3  }
  0x32   : > { %s2703_s13 = smov [#allocation16]   ;;  %p55_p6 = scmp.ge.s32.totalorder %s54_s8, 2 }
  0x33   : > { %s536_s20 = sshll.u32 %s2703_s13, 4  ;;  %s57_s15 = sadd.s32 1, %s2693_s30  ;;  %s537_s20 = int_to_ptr.vmem [resolvable:$true] %s536_s20 }
  0x34   : > { %s534_s7 = sshll.u32 %s3324_s10, 4  ;;  %s66_s28 = sadd.s32 1, %s2677_s26  ;;  %s535_s7 = int_to_ptr.hbm [resolvable:$true] %s534_s7 }
  0x35   : > { %2050 = dma.hbm_to_vmem [thread:$0]  (!%p2866_p5), %s535_s7, 1024, %s537_s20, [#allocation17], %s3281_s19, %s3281_s19, %s3283_s3  }
  0x36   : > { %p73_p7 = scmp.ne.s32.totalorder %s2677_s26, %s2673_s25  ;;  %s3377_s8 = smov (%p55_p6, %s54_s8), 0 }
  0x37   : > { %3325 = sst [smem:[#allocation39_spill]] %s3377_s8  ;;  %s3379_s15 = smov (!%p55_p6, %s57_s15), %s2693_s30 }
  0x38   : > { %s62_s18 = ssub.s32 %s2689_s29, %s3377_s8  ;;  %p74_p8 = scmp.eq.s32.totalorder %s2697_s0, 0 }
  0x39   : > { %p59_p9 = scmp.ge.s32.totalorder %s3379_s15, 2  ;;  %p79_p10 = scmp.ne.s32.totalorder %s2673_s25, %s2669_s24 }
  0x3a   : > { %p75_p11 = por %p74_p8, %p73_p7  ;;  %p2083_p12 = scmp.lt.s32.totalorder %s2697_s0, 4 }
  0x3b   : > { %s3381_s15 = smov (%p59_p9, %s3379_s15), 0  ;;  %p2911_p13 = por %p80_p1, %p79_p10 }
  0x3c   : > { %3326 = sst [smem:[#allocation40_spill]] %s3381_s15  ;;  %s3287_s12 = sand.u32 1, %s2677_s26  }
  0x3d   : > { %s3327_s7 = scalar_select %p2911_p13, 1, 0 }
  0x3e   : > { %s2918_s13 = ssub.s32 %s2693_s30, %s3381_s15  ;;  %s2922_s20 = sshll.u32 %s3287_s12, 5 }
  0x3f   : > { %3328 = sst [smem:[#allocation41_spill]] %s3327_s7  ;;  %s63_s24 = sor.u32 %s62_s18, %s2918_s13 }
  0x40   : > { %s1921_s19 = sshll.u32 %s2693_s30, 4  ;;  %p64_p0 = scmp.eq.s32.totalorder %s63_s24, 0 }
  0x41   : > { %s2927_s3 = sadd.s32 %s2689_s29, %s1921_s19  ;;  %p2932_p2 = pnand %p2083_p12, %p75_p11 }
  0x42   : > { %s3293_s10 = sshll.u32 %s2927_s3, 2  ;;  %s591_s4 = sand.u32 1, %s2697_s0  }
  0x43   : > { %s2937_s15 = scalar_select %p64_p0, %s2677_s26, %s66_s28  }
  0x44   : > { %s3331_s1 = sld [smem:[#allocation44_spill]]  ;;  %s595_s24 = scalar_lea.vmem [#allocation7], %s2922_s20 }
  0x45   : > { %3330 = sst [smem:[#allocation42_spill]] %s2937_s15  ;;  %s605_s29 = sshll.u32 %s595_s24, 4  ;;  %s606_s29 = int_to_ptr.vmem [resolvable:$true] %s605_s29 }
  0x46   : > { %s2946_s27 = scalar_lea.sflag [#allocation8], %s591_s4  ;;  %s3294_s7 = smov 128  }
  0x47   : > { %s3332_s28 = smov 4   ;;  %s3333_s15 = smov 64  }
  0x48   : > { %s3334_s5 = sld [smem:[#allocation48_spill]]  ;;  %s2705_s12 = smov [#allocation12]  }
  0x49   : > { %s3335_s9 = sld [smem:[#allocation52_spill]]  ;;  %s3336_s4 = sshll.u32 %s2927_s3, 2 }
  0x4a   : > { %s602_s18 = scalar_lea.hbm %s3331_s1, %s3293_s10  ;;  %s3337_s25 = sld [smem:[#allocation43_spill]] }
  0x4b   : > { %s603_s19 = sshll.u32 %s602_s18, 4  ;;  %s488_s18 = sshll.u32 %s2705_s12, 4  ;;  %s604_s19 = int_to_ptr.hbm [resolvable:$true] %s603_s19  ;;  %s489_s18 = int_to_ptr.vmem [resolvable:$true] %s488_s18 }
  0x4c   : > { %2060 = dma.hbm_to_vmem [thread:$0]  (!%p2932_p2), %s604_s19, 512, %s606_s29, %s2946_s27, %s3294_s7, %s3333_s15, %s3332_s28  }
  0x4d   : > { %s2706_s29 = smov [#allocation15]   ;;  %s548_s12 = sshll.u32 %s3271_s11, 4  ;;  %s549_s12 = int_to_ptr.hbm [resolvable:$true] %s548_s12 }
  0x4e   : > { %s486_s6 = sshll.u32 %s3334_s5, 4  ;;  %s522_s16 = sshll.u32 %s2706_s29, 4  ;;  %s487_s6 = int_to_ptr.hbm [resolvable:$true] %s486_s6  ;;  %s523_s16 = int_to_ptr.vmem [resolvable:$true] %s522_s16 }
  0x4f   : > { %s520_s10 = sshll.u32 %s3335_s9, 4  ;;  %s3338_s3 = sand.u32 1, %s2677_s26   ;;  %s521_s10 = int_to_ptr.hbm [resolvable:$true] %s520_s10 }
  0x50   : > { %2041 = dma.hbm_to_vmem [thread:$0]  (!%p2866_p5), %s487_s6, 256, %s489_s18, [#allocation11], %s3333_s15, %s3333_s15, %s3332_s28  }
  0x51   : > { %2047 = dma.hbm_to_vmem [thread:$0]  (!%p2866_p5), %s521_s10, 1024, %s523_s16, [#allocation14], %s3333_s15, %s3333_s15, %s3332_s28  }
  0x52   : > { %s2707_s6 = smov [#allocation18]   ;;  %s578_s19 = scalar_lea.hbm %s3337_s25, %s3336_s4 }
  0x53   : > { %s550_s18 = sshll.u32 %s2707_s6, 4  ;;  %s579_s10 = sshll.u32 %s578_s19, 4  ;;  %s551_s18 = int_to_ptr.vmem [resolvable:$true] %s550_s18  ;;  %s580_s10 = int_to_ptr.hbm [resolvable:$true] %s579_s10 }
  0x54   : > { %2053 = dma.hbm_to_vmem [thread:$0]  (!%p2866_p5), %s549_s12, 1024, %s551_s18, [#allocation17], %s3333_s15, %s3333_s15, %s3332_s28  }
  0x55   : > { %s571_s16 = scalar_lea.vmem [#allocation4], %s2922_s20  ;;  %s568_s7 = scalar_lea.sflag [#allocation5], %s3338_s3 }
  0x56   : > { %s581_s6 = sshll.u32 %s571_s16, 4  ;;  %s3339_s4 = smov 128   ;;  %s582_s6 = int_to_ptr.vmem [resolvable:$true] %s581_s6 }
  0x57   : > { %2057 = dma.hbm_to_vmem [thread:$0]  (!%p2932_p2), %s580_s10, 512, %s582_s6, %s568_s7, %s3339_s4, %s3333_s15, %s3332_s28  }
  0x58   : > { %s3295_s14 = sadd.s32 4294967294, %s2697_s0   ;;  %p118_p4 = scmp.eq.s32.totalorder %s2918_s13, 0 }
  0x59   : > { %s120_s24 = sadd.s32 1, %s2665_s23  ;;  %p127_p5 = scmp.ne.s32.totalorder %s2665_s23, %s2661_s22 }
  0x5a   : > { %s2997_s12 = scalar_select %p118_p4, %s2665_s23, %s120_s24  }
  0x5b   : > { %p3001_p6 = por %p127_p5, %p74_p8  ;;  %p133_p7 = scmp.ne.s32.totalorder %s2661_s22, %s2657_s21 }
  0x5c   : > { %p367_p9 = scmp.eq.s32.totalorder %s2850_s17, 3  ;;  %p373_p10 = scmp.eq.s32.totalorder %s3295_s14, 3 }
  0x5d   : > { %p3012_p11 = por %p133_p7, %p80_p1  ;;  %s617_s15 = sand.u32 1, %s2665_s23  }
  0x5e   : > { %p3017_p0 = por %p367_p9, %p127_p5  ;;  %p3021_p8 = por %p373_p10, %p133_p7 }
  0x5f   : > { %s1747_s28 = sshll.u32 %s617_s15, 2  ;;  %s1748_s18 = sshll.u32 %s2693_s30, 2 }
  0x60   : > { %s3344_s2 = sld [smem:[#allocation45_spill]]  ;;  %s619_s16 = scalar_lea.vmem [#allocation9], %s1747_s28 }
  0x61   : > { %s627_s6 = sshll.u32 %s619_s16, 4  ;;  %p2061_p2 = pnand %p2083_p12, %p3001_p6  ;;  %s628_s6 = int_to_ptr.vmem [resolvable:$true] %s627_s6 }
  0x62   : > { %s3346_s4 = sld [smem:[#allocation34_spill]] (!%p2858_p3) }
  0x64   : > { %636 = sbr.rel (%p2858_p3) target bundleno = 559 (0x22f), region = 72 }
  0x66   : > { %s623_s19 = scalar_lea.hbm %s3344_s2, %s1748_s18 }
  0x67   : > { %s625_s10 = sshll.u32 %s623_s19, 4  ;;  %s626_s10 = int_to_ptr.hbm [resolvable:$true] %s625_s10 }
  0x68   : > { %2063 = dma.hbm_to_vmem [thread:$0]  (!%p2061_p2), %s626_s10, 64, %s628_s6, %s2946_s27  }
  0x69   : > { %s638_s15 = sand.u32 1, %s3346_s4  }
  0x6a   : > { %s1750_s14 = sshll.u32 %s638_s15, 5  ;;  %s639_s1 = scalar_lea.sflag [#allocation5], %s638_s15 }
  0x6b   : > { %s3037_s5 = scalar_lea.vmem [#allocation4], %s1750_s14 }
  0x6c   : > { %2620 = dma.done.wait (%p2911_p13), %s639_s1, 512  }
  0x6d   : > { %2622 = vsyncadd (%p2911_p13), %s639_s1, 4294966784  ;;  %s648_s20 = sand.u32 1, %s2850_s17   ;;  %s3046_s28 = scalar_lea.vmem [#allocation7], %s1750_s14 }
  0x6e   : > { %s649_s27 = scalar_lea.sflag [#allocation8], %s648_s20 }
  0x6f   : > { %2624 = dma.done.wait (%p2911_p13), %s649_s27, 512  }
  0x70   : > { %2626 = vsyncadd (%p2911_p13), %s649_s27, 4294966784  ;;  %s3053_s18 = sand.u32 1, %s2661_s22  }
  0x71   : > { %s1752_s29 = sshll.u32 %s3053_s18, 2 }
  0x72   : > { %s3056_s1 = scalar_lea.vmem [#allocation9], %s1752_s29 }
  0x73   : > { %2628 = dma.done.wait (%p3012_p11), %s649_s27, 64  }
  0x74   : > { %2630 = vsyncadd (%p3012_p11), %s649_s27, 4294967232 }
  0x75   : > { %2632 = dma.done.wait (%p80_p1), [#allocation11], 512  }
  0x76   : > { %2634 = vsyncadd (%p80_p1), [#allocation11], 4294966784 }
  0x77   : > { %2636 = dma.done.wait (%p80_p1), [#allocation14], 2048  }
  0x78   : > { %2638 = vsyncadd (%p80_p1), [#allocation14], 4294965248 }
  0x79   : > { %2640 = dma.done.wait (%p80_p1), [#allocation17], 2048  }
  0x7a   : > { %2642 = vsyncadd (%p80_p1), [#allocation17], 4294965248  ;;  %s3075_s14 = sshll.u32 %s3053_s18, 3  ;;  %s3348_s16 = sld [smem:[#allocation35_spill]] }
  0x7b   : > { %s745_s8 = scalar_lea.vmem [#allocation19], %s3075_s14  ;;  %s752_s25 = scalar_lea.vmem [#allocation20], %s3075_s14 }
  0x7c   : > { %s3297_s19 = scalar_lea.vmem [#allocation22], %s3075_s14  ;;  %s3296_s10 = scalar_lea.vmem [#allocation23], %s3075_s14 }
  0x80   : > { %p1763_p3 = scmp.ne.s32.totalorder %s3348_s16, 0 }
  0x82   : > { %773 = sbr.rel (%p1763_p3) target bundleno = 138 (0x8a), region = 112 }
  0x87   : > { %vm774_vm0 = vcmask 261120   ;;  %v2708_v0 = vmov 0.0  }
  0x88   : > { %775 = vst.msk [vmem:[#allocation2] sm:$0xff] %vm774_vm0, %v2708_v0 }
  0x89   : > { %776 = vst.msk [vmem:[#allocation3] sm:$0xff] %vm774_vm0, %v2708_v0 }
  0x8a PF: > { %v1960_v1 = vld [vmem:[%s3037_s5] sm:$0xff]   ;;  %v1991_v2 = vld [vmem:[%s3037_s5 + $0x8] sm:$0xff]   ;;  %vm794_vm1 = vcmask 261120   ;;  %v1992_v7 = vld [vmem:[%s3037_s5 + $0x10] sm:$0xff]   ;;  %vm859_vm2 = vcmask 1041409   ;;  %vm861_vm3 = vcmask 1042434  }
  0x8b   : > { %v1961_v3 = vunpack.c.l.bf16 %v1960_v1  ;;  %v1962_v4 = vunpack.c.h.bf16 %v1960_v1  ;;  %v1965_v5 = vunpack.c.l.bf16 %v1991_v2  ;;  %v1966_v6 = vunpack.c.h.bf16 %v1991_v2  ;;  %v1993_v8 = vld [vmem:[%s3037_s5 + $0x18] sm:$0xff]   ;;  %v1976_v1 = vld [vmem:[%s3046_s28] sm:$0xff]   ;;  %s3349_s5 = sld [smem:[#allocation35_spill]] }
  0x8c   : > { %v1969_v9 = vunpack.c.l.bf16 %v1992_v7  ;;  %v1970_v10 = vunpack.c.h.bf16 %v1992_v7  ;;  %v1973_v11 = vunpack.c.l.bf16 %v1993_v8  ;;  %v1974_v12 = vunpack.c.h.bf16 %v1993_v8  ;;  %v1995_v8 = vld [vmem:[%s3046_s28 + $0x10] sm:$0xff]  }
  0x8d   : > { %v795_v13 = vsel %vm794_vm1, %v1961_v3, 0.0  ;;  %v802_v14 = vsel %vm794_vm1, %v1962_v4, 0.0  ;;  %v809_v15 = vsel %vm794_vm1, %v1965_v5, 0.0  ;;  %v816_v16 = vsel %vm794_vm1, %v1966_v6, 0.0  ;;  %v1994_v3 = vld [vmem:[%s3046_s28 + $0x8] sm:$0xff]  }
  0x8e   : > { %v796_v17 = vrot.slane %v795_v13, 4  ;;  %v803_v18 = vrot.slane %v802_v14, 4  ;;  %v810_v19 = vrot.slane %v809_v15, 4  ;;  %v817_v20 = vrot.slane %v816_v16, 4 }
  0x8f   : > { %v823_v21 = vsel %vm794_vm1, %v1969_v9, 0.0  ;;  %v830_v22 = vsel %vm794_vm1, %v1970_v10, 0.0  ;;  %v837_v23 = vsel %vm794_vm1, %v1973_v11, 0.0  ;;  %v844_v24 = vsel %vm794_vm1, %v1974_v12, 0.0  ;;  %v1996_v9 = vld [vmem:[%s3046_s28 + $0x18] sm:$0xff]  }
  0x90   : > { %v797_v25 = vadd.f32 %v796_v17, %v795_v13  ;;  %v804_v26 = vadd.f32 %v803_v18, %v802_v14  ;;  %v811_v27 = vadd.f32 %v810_v19, %v809_v15  ;;  %v818_v28 = vadd.f32 %v817_v20, %v816_v16  ;;  %v777_v20 = vld [vmem:[#allocation2] sm:$0xff] }
  0x91   : > { %v824_v29 = vrot.slane %v823_v21, 4  ;;  %v831_v30 = vrot.slane %v830_v22, 4  ;;  %v838_v31 = vrot.slane %v837_v23, 4  ;;  %v845_v32 = vrot.slane %v844_v24, 4  ;;  %p1764_p1 = scmp.ne.s32.totalorder %s3349_s5, 1 }
  0x92   : > { %v798_v33 = vrot.slane %v797_v25, 2  ;;  %v805_v34 = vrot.slane %v804_v26, 2  ;;  %v812_v35 = vrot.slane %v811_v27, 2  ;;  %v819_v36 = vrot.slane %v818_v28, 2  ;;  %s3350_s4 = sld [smem:[#allocation49_spill]] (!%p1764_p1) }
  0x93   : > { %v825_v37 = vadd.f32 %v824_v29, %v823_v21  ;;  %v832_v38 = vadd.f32 %v831_v30, %v830_v22  ;;  %v839_v39 = vadd.f32 %v838_v31, %v837_v23  ;;  %v846_v40 = vadd.f32 %v845_v32, %v844_v24  ;;  %s3351_s27 = sld [smem:[#allocation47_spill]] (!%p1764_p1) }
  0x94   : > { %v799_v41 = vadd.f32 %v798_v33, %v797_v25  ;;  %v806_v42 = vadd.f32 %v805_v34, %v804_v26  ;;  %v813_v43 = vadd.f32 %v812_v35, %v811_v27  ;;  %v820_v44 = vadd.f32 %v819_v36, %v818_v28  ;;  %s3353_s6 = sld [smem:[#allocation54_spill]] (!%p1764_p1) }
  0x95   : > { %v826_v45 = vrot.slane %v825_v37, 2  ;;  %v833_v46 = vrot.slane %v832_v38, 2  ;;  %v840_v47 = vrot.slane %v839_v39, 2  ;;  %v847_v48 = vrot.slane %v846_v40, 2 }
  0x96   : > { %v800_v49 = vrot.slane %v799_v41, 1  ;;  %v807_v50 = vrot.slane %v806_v42, 1  ;;  %v814_v51 = vrot.slane %v813_v43, 1  ;;  %v821_v52 = vrot.slane %v820_v44, 1 }
  0x97   : > { %v827_v53 = vadd.f32 %v826_v45, %v825_v37  ;;  %v834_v54 = vadd.f32 %v833_v46, %v832_v38  ;;  %v841_v55 = vadd.f32 %v840_v47, %v839_v39  ;;  %v848_v56 = vadd.f32 %v847_v48, %v846_v40 }
  0x98   : > { %v801_v57 = vadd.f32 %v800_v49, %v799_v41  ;;  %v808_v58 = vadd.f32 %v807_v50, %v806_v42  ;;  %v815_v59 = vadd.f32 %v814_v51, %v813_v43  ;;  %v822_v60 = vadd.f32 %v821_v52, %v820_v44 }
  0x99   : > { %v828_v61 = vrot.slane %v827_v53, 1  ;;  %v835_v62 = vrot.slane %v834_v54, 1  ;;  %v842_v63 = vrot.slane %v841_v55, 1  ;;  %v849_v0 = vrot.slane %v848_v56, 1 }
  0x9a   : > { %v860_v2 = vsel %vm859_vm2, %v808_v58, %v801_v57  ;;  %vm863_vm4 = vcmask 1043459   ;;  %vm865_vm5 = vcmask 1044484   ;;  %vm867_vm6 = vcmask 1045509  }
  0x9b   : > { %v829_v4 = vadd.f32 %v828_v61, %v827_v53  ;;  %v836_v5 = vadd.f32 %v835_v62, %v834_v54  ;;  %v843_v6 = vadd.f32 %v842_v63, %v841_v55  ;;  %v850_v7 = vadd.f32 %v849_v0, %v848_v56 }
  0x9c   : > { %v862_v10 = vsel %vm861_vm3, %v815_v59, %v860_v2  ;;  %vm869_vm7 = vcmask 1046534   ;;  %vm871_vm8 = vcmask 1047559   ;;  %v1977_v11 = vunpack.c.l.bf16 %v1976_v1 }
  0x9d   : > { %v864_v12 = vsel %vm863_vm4, %v822_v60, %v862_v10  ;;  %v1978_v13 = vunpack.c.h.bf16 %v1976_v1  ;;  %v1981_v14 = vunpack.c.l.bf16 %v1994_v3  ;;  %v1982_v15 = vunpack.c.h.bf16 %v1994_v3 }
  0x9e   : > { %v866_v16 = vsel %vm865_vm5, %v829_v4, %v864_v12  ;;  %v1985_v17 = vunpack.c.l.bf16 %v1995_v8  ;;  %v1986_v18 = vunpack.c.h.bf16 %v1995_v8  ;;  %v1989_v19 = vunpack.c.l.bf16 %v1996_v9 }
  0x9f   : > { %v868_v21 = vsel %vm867_vm6, %v836_v5, %v866_v16  ;;  %v1990_v22 = vunpack.c.h.bf16 %v1996_v9  ;;  %v893_v23 = vsel %vm794_vm1, %v1977_v11, 0.0  ;;  %v900_v24 = vsel %vm794_vm1, %v1978_v13, 0.0 }
  0xa0   : > { %v870_v25 = vsel %vm869_vm7, %v843_v6, %v868_v21  ;;  %v894_v26 = vrot.slane %v893_v23, 4  ;;  %v901_v27 = vrot.slane %v900_v24, 4  ;;  %v907_v28 = vsel %vm794_vm1, %v1981_v14, 0.0 }
  0xa1   : > { %v872_v29 = vsel %vm871_vm8, %v850_v7, %v870_v25  ;;  %v908_v30 = vrot.slane %v907_v28, 4  ;;  %v914_v31 = vsel %vm794_vm1, %v1982_v15, 0.0  ;;  %v921_v32 = vsel %vm794_vm1, %v1985_v17, 0.0 }
  0xa2   : > { %v874_v33 = vadd.f32 %v872_v29, %v777_v20  ;;  %v895_v34 = vadd.f32 %v894_v26, %v893_v23  ;;  %v902_v35 = vadd.f32 %v901_v27, %v900_v24  ;;  %v915_v36 = vrot.slane %v914_v31, 4 }
  0xa3   : > { %v909_v37 = vadd.f32 %v908_v30, %v907_v28  ;;  %v922_v38 = vrot.slane %v921_v32, 4  ;;  %v928_v39 = vsel %vm794_vm1, %v1986_v18, 0.0  ;;  %v935_v40 = vsel %vm794_vm1, %v1989_v19, 0.0 }
  0xa4   : > { %875 = vst.msk [vmem:[#allocation2] sm:$0xff] %vm794_vm1, %v874_v33  ;;  %v896_v41 = vrot.slane %v895_v34, 2  ;;  %v903_v42 = vrot.slane %v902_v35, 2  ;;  %v916_v43 = vadd.f32 %v915_v36, %v914_v31  ;;  %v929_v44 = vrot.slane %v928_v39, 4 }
  0xa5   : > { %v910_v45 = vrot.slane %v909_v37, 2  ;;  %v923_v46 = vadd.f32 %v922_v38, %v921_v32  ;;  %v936_v47 = vrot.slane %v935_v40, 4  ;;  %v942_v48 = vsel %vm794_vm1, %v1990_v22, 0.0  ;;  %v876_v22 = vld [vmem:[#allocation3] sm:$0xff] }
  0xa6   : > { %v897_v49 = vadd.f32 %v896_v41, %v895_v34  ;;  %v904_v50 = vadd.f32 %v903_v42, %v902_v35  ;;  %v917_v51 = vrot.slane %v916_v43, 2  ;;  %v930_v52 = vadd.f32 %v929_v44, %v928_v39 }
  0xa7   : > { %v911_v53 = vadd.f32 %v910_v45, %v909_v37  ;;  %v924_v54 = vrot.slane %v923_v46, 2  ;;  %v937_v55 = vadd.f32 %v936_v47, %v935_v40  ;;  %v943_v56 = vrot.slane %v942_v48, 4 }
  0xa8   : > { %v898_v57 = vrot.slane %v897_v49, 1  ;;  %v905_v58 = vrot.slane %v904_v50, 1  ;;  %v918_v59 = vadd.f32 %v917_v51, %v916_v43  ;;  %v931_v60 = vrot.slane %v930_v52, 2 }
  0xa9   : > { %v912_v61 = vrot.slane %v911_v53, 1  ;;  %v925_v62 = vadd.f32 %v924_v54, %v923_v46  ;;  %v938_v63 = vrot.slane %v937_v55, 2  ;;  %v944_v0 = vadd.f32 %v943_v56, %v942_v48 }
  0xaa   : > { %v899_v1 = vadd.f32 %v898_v57, %v897_v49  ;;  %v906_v2 = vadd.f32 %v905_v58, %v904_v50  ;;  %v919_v3 = vrot.slane %v918_v59, 1  ;;  %v932_v4 = vadd.f32 %v931_v60, %v930_v52 }
  0xab   : > { %v913_v5 = vadd.f32 %v912_v61, %v911_v53  ;;  %v926_v6 = vrot.slane %v925_v62, 1  ;;  %v939_v7 = vadd.f32 %v938_v63, %v937_v55  ;;  %v945_v8 = vrot.slane %v944_v0, 2 }
  0xac   : > { %v920_v9 = vadd.f32 %v919_v3, %v918_v59  ;;  %v933_v10 = vrot.slane %v932_v4, 1  ;;  %v957_v11 = vsel %vm859_vm2, %v906_v2, %v899_v1 }
  0xad   : > { %v927_v12 = vadd.f32 %v926_v6, %v925_v62  ;;  %v940_v13 = vrot.slane %v939_v7, 1  ;;  %v946_v14 = vadd.f32 %v945_v8, %v944_v0  ;;  %v958_v15 = vsel %vm861_vm3, %v913_v5, %v957_v11 }
  0xae   : > { %v934_v16 = vadd.f32 %v933_v10, %v932_v4  ;;  %v959_v17 = vsel %vm863_vm4, %v920_v9, %v958_v15 }
  0xaf   : > { %v941_v18 = vadd.f32 %v940_v13, %v939_v7  ;;  %v947_v19 = vrot.slane %v946_v14, 1  ;;  %v960_v20 = vsel %vm865_vm5, %v927_v12, %v959_v17 }
  0xb0   : > { %v961_v21 = vsel %vm867_vm6, %v934_v16, %v960_v20 }
  0xb1   : > { %v948_v23 = vadd.f32 %v947_v19, %v946_v14  ;;  %v962_v24 = vsel %vm869_vm7, %v941_v18, %v961_v21 }
  0xb2   : > { %970 = sbr.rel (%p1764_p1) target bundleno = 485 (0x1e5), region = 116 }
  0xb3   : > { %v963_v25 = vsel %vm871_vm8, %v948_v23, %v962_v24 }
  0xb4   : > { %v965_v26 = vadd.f32 %v963_v25, %v876_v22 }
  0xb6   : > { %966 = vst.msk [vmem:[#allocation3] sm:$0xff] %vm794_vm1, %v965_v26 }
  0xb7   : > { %v1934_v27 = vld [vmem:[#allocation13 + $0x38] sm:$0xff]  ;;  %v1933_v29 = vld [vmem:[#allocation13 + $0x30] sm:$0xff]  ;;  %v1924_v30 = vld [vmem:[#allocation10 + $0x8] sm:$0xff] }
  0xb8   : > { %v1926_v28 = vld [vmem:[#allocation12 + $0x8] sm:$0xff]  ;;  %1118 = vmatpush.bf16.msra.mxu2 %v1934_v27  ;;  %v1925_v31 = vld [vmem:[#allocation12] sm:$0xff]  ;;  %1007 = vmatpush.bf16.msra.mxu0 %v1924_v30  ;;  %v1923_v34 = vld [vmem:[#allocation10] sm:$0xff] }
  0xb9   : > { %1043 = vmatpush.bf16.msra.mxu1 %v1926_v28  ;;  %v971_v35 = vld [vmem:[#allocation2] sm:$0xff]  ;;  %v1950_v37 = vld [vmem:[#allocation16 + $0x38] sm:$0xff]  ;;  %v1949_v42 = vld [vmem:[#allocation16 + $0x30] sm:$0xff] }
  0xba   : > { %v972_v36 = vmul.f32 0.0625, %v971_v35  ;;  %v1942_v38 = vld [vmem:[#allocation15 + $0x38] sm:$0xff]  ;;  %v1932_v39 = vld [vmem:[#allocation13 + $0x28] sm:$0xff]  ;;  %1213 = vmatpush.bf16.msra.mxu3 %v1950_v37  ;;  %v1941_v44 = vld [vmem:[#allocation15 + $0x30] sm:$0xff] }
  0xbb   : > { %v1958_v43 = vld [vmem:[#allocation18 + $0x38] sm:$0xff]  ;;  %v1957_v45 = vld [vmem:[#allocation18 + $0x30] sm:$0xff]  ;;  %v1931_v46 = vld [vmem:[#allocation13 + $0x20] sm:$0xff] }
  0xbc   : > { %1119 = vmatpush.bf16.msra.mxu2 %v1933_v29  ;;  %v973_v41 = vpack.c.bf16 %v972_v36, %v972_v36  ;;  %1008 = vmatpush.bf16.msra.mxu0 %v1923_v34  ;;  %v1948_v47 = vld [vmem:[#allocation16 + $0x28] sm:$0xff]  ;;  %v1930_v50 = vld [vmem:[#allocation13 + $0x18] sm:$0xff]  ;;  %v1947_v51 = vld [vmem:[#allocation16 + $0x20] sm:$0xff] }
  0xbd   : > { %v974_v32 = vld [vmem:[#allocation3] sm:$0xff]  ;;  %1044 = vmatpush.bf16.msra.mxu1 %v1925_v31  ;;  %v1940_v48 = vld [vmem:[#allocation15 + $0x28] sm:$0xff]  ;;  %v1939_v52 = vld [vmem:[#allocation15 + $0x20] sm:$0xff] }
  0xbe   : > { %v975_v33 = vmul.f32 0.0625, %v974_v32  ;;  %1214 = vmatpush.bf16.msra.mxu3 %v1949_v42  ;;  %v1956_v49 = vld [vmem:[#allocation18 + $0x28] sm:$0xff]  ;;  %v1929_v53 = vld [vmem:[#allocation13 + $0x10] sm:$0xff]  ;;  %v1946_v54 = vld [vmem:[#allocation16 + $0x18] sm:$0xff] }
  0xbf   : > { %1773 = vmatmul.msk.bf16.vlgmr.msra.gmra.mxu0 %vm794_vm1, %v973_v41  ;;  %v1938_v55 = vld [vmem:[#allocation15 + $0x18] sm:$0xff]  ;;  %v1928_v56 = vld [vmem:[#allocation13 + $0x8] sm:$0xff]  ;;  %v1945_v57 = vld [vmem:[#allocation16 + $0x10] sm:$0xff] }
  0xc0   : > { %v976_v40 = vpack.c.bf16 %v975_v33, %v975_v33  ;;  %1274 = vmatpush.bf16.msrb.mxu0 %v1942_v38  ;;  %1120 = vmatpush.bf16.msra.mxu2 %v1932_v39  ;;  %v1927_v58 = vld [vmem:[#allocation13] sm:$0xff]  ;;  %v1944_v59 = vld [vmem:[#allocation16 + $0x8] sm:$0xff]  ;;  %v977_v60 = vld [vmem:[%s3056_s1] sm:$0xf]  ;;  %s3352_s1 = sld [smem:[#allocation51_spill]] }
  0xc1   : > { %1352 = vmatpush.bf16.msrb.mxu1 %v1958_v43  ;;  %v1937_v61 = vld [vmem:[#allocation15 + $0x10] sm:$0xff]  ;;  %v1955_v62 = vld [vmem:[#allocation18 + $0x20] sm:$0xff]  ;;  %v1936_v0 = vld [vmem:[#allocation15 + $0x8] sm:$0xff] }
  0xc2   : > { %1782 = vmatmul.msk.bf16.vlgmr.msra.gmra.mxu1 %vm794_vm1, %v976_v40  ;;  %1215 = vmatpush.bf16.msra.mxu3 %v1948_v47  ;;  %v1943_v63 = vld [vmem:[#allocation16] sm:$0xff]  ;;  %v1954_v1 = vld [vmem:[#allocation18 + $0x18] sm:$0xff]  ;;  %v1953_v3 = vld [vmem:[#allocation18 + $0x10] sm:$0xff] }
  0xc3   : > { %v1935_v2 = vld [vmem:[#allocation15] sm:$0xff]  ;;  %v1952_v4 = vld [vmem:[#allocation18 + $0x8] sm:$0xff] }
  0xc4   : > { %1275 = vmatpush.bf16.msrb.mxu0 %v1941_v44  ;;  %1121 = vmatpush.bf16.msra.mxu2 %v1931_v46  ;;  %v2189_v5 = vld [vmem:[%s3350_s4] ss:$0 sm:$0xff]  ;;  %v1951_v6 = vld [vmem:[#allocation18] sm:$0xff] }
  0xc5   : > { %1353 = vmatpush.bf16.msrb.mxu1 %v1957_v45  ;;  %v2190_v7 = vld [vmem:[%s3351_s27] ss:$0 sm:$0xff] }
  0xc6   : > { %1216 = vmatpush.bf16.msra.mxu3 %v1947_v51  ;;  %v2191_v16 = vld [vmem:[%s3352_s1] ss:$0 sm:$0xff] }
  0xc7   : > { %v2192_v26 = vld [vmem:[%s3353_s6] ss:$0 sm:$0xff] }
  0xc8   : > { %1276 = vmatpush.bf16.msrb.mxu0 %v1940_v48  ;;  %1122 = vmatpush.bf16.msra.mxu2 %v1930_v50 }
  0xc9   : > { %1354 = vmatpush.bf16.msrb.mxu1 %v1956_v49 }
  0xca   : > { %1217 = vmatpush.bf16.msra.mxu3 %v1946_v54 }
  0xcc   : > { %1277 = vmatpush.bf16.msrb.mxu0 %v1939_v52  ;;  %1123 = vmatpush.bf16.msra.mxu2 %v1929_v53 }
  0xcd   : > { %1355 = vmatpush.bf16.msrb.mxu1 %v1955_v62 }
  0xce   : > { %1218 = vmatpush.bf16.msra.mxu3 %v1945_v57 }
  0xd0   : > { %1278 = vmatpush.bf16.msrb.mxu0 %v1938_v55  ;;  %1124 = vmatpush.bf16.msra.mxu2 %v1928_v56 }
  0xd1   : > { %1356 = vmatpush.bf16.msrb.mxu1 %v1954_v1 }
  0xd2   : > { %1219 = vmatpush.bf16.msra.mxu3 %v1944_v59 }
  0xd4   : > { %1125 = vmatpush.bf16.msra.mxu2 %v1927_v58  ;;  %1279 = vmatpush.bf16.msrb.mxu0 %v1937_v61 }
  0xd5   : > { %1357 = vmatpush.bf16.msrb.mxu1 %v1953_v3 }
  0xd6   : > { %1220 = vmatpush.bf16.msra.mxu3 %v1943_v63 }
  0xd7   : > { %1126 = vmatmul.bf16.vlgmr.msra.gmra.mxu2 %v977_v60 }
  0xd8   : > { %1280 = vmatpush.bf16.msrb.mxu0 %v1936_v0 }
  0xd9   : > { %1358 = vmatpush.bf16.msrb.mxu1 %v1952_v4 }
  0xdc   : > { %1281 = vmatpush.bf16.msrb.mxu0 %v1935_v2 }
  0xdd   : > { %1359 = vmatpush.bf16.msrb.mxu1 %v1951_v6 }
 0x13c   : > { %v1010_v10 = vpop.f32.mrf.mxu0 }
 0x13d   : > { %v1011_v11 = vadd.f32 %v2190_v7, %v1010_v10 }
 0x13f   : > { %v1046_v8 = vpop.f32.mrf.mxu1  ;;  %v1131_v13 = vpack.c.bf16 %v1011_v11, %v1011_v11  ;;  %1372 = vst [vmem:[%s752_s25] sm:$0xff] %v1011_v11 }
 0x140   : > { %v1047_v9 = vadd.f32 %v2189_v5, %v1046_v8 }
 0x141   : > { %1282 = vmatmul.bf16.vlgmr.msrb.gmra.mxu0 %v1131_v13 }
 0x142   : > { %1373 = vst [vmem:[%s3297_s19] sm:$0xff] %v1047_v9  ;;  %v1148_v12 = vpack.c.bf16 %v1047_v9, %v1047_v9 }
 0x144   : > { %1221 = vmatmul.bf16.vlgmr.msra.gmra.mxu3 %v1148_v12  ;;  %v1012_v15 = vpop.f32.mrf.mxu0 }
 0x147   : > { %v1048_v14 = vpop.f32.mrf.mxu1 }
 0x15a   : > { %v1127_v17 = vpop.f32.mrf.mxu2 }
 0x15b   : > { %v1128_v18 = vadd.f32 %v2191_v16, %v1127_v17 }
 0x15d   : > { %v1287_v19 = vpack.c.bf16 %v1128_v18, %v1128_v18  ;;  %1374 = vst [vmem:[%s3296_s10] sm:$0xff] %v1128_v18 }
 0x15f   : > { %1360 = vmatmul.bf16.vlgmr.msrb.gmra.mxu1 %v1287_v19 }
 0x162   : > { %v1129_v20 = vpop.f32.mrf.mxu2 }
 0x1be   : > { %v1283_v21 = vpop.f32.mrf.mxu0 }
 0x1c6   : > { %v1285_v23 = vpop.f32.mrf.mxu0 }
 0x1c7   : > { %v1222_v22 = vpop.f32.mrf.mxu3 }
 0x1c8   : > { %v1284_v25 = vadd.f32 %v1283_v21, %v1222_v22 }
 0x1cf   : > { %v1224_v24 = vpop.f32.mrf.mxu3 }
 0x1dc   : > { %v1361_v27 = vpop.f32.mrf.mxu1 }
 0x1dd   : > { %v1365_v28 = vadd.f32 %v1361_v27, %v1284_v25 }
 0x1df   : > { %v1370_v29 = vadd.f32 %v2192_v26, %v1365_v28 }
 0x1e1   : > { %1371 = vst [vmem:[%s745_s8] sm:$0xff] %v1370_v29 }
 0x1e4   : > { %v1363_v30 = vpop.f32.mrf.mxu1 }
 0x1e5 PF: > { %s3354_s3 = sld [smem:[#allocation36_spill]]  ;;  %s1417_s29 = sshll.u32 %s752_s25, 4  ;;  %s1418_s29 = int_to_ptr.vmem [resolvable:$true] %s1417_s29 }
 0x1e6   : > { %s3355_s27 = sld [smem:[#allocation56_spill]]  ;;  %s3157_s5 = scalar_lea.sflag [#allocation21], %s648_s20 }
 0x1eb   : > { %s3147_s4 = sshll.u32 %s3354_s3, 3 }
 0x1ec   : > { %s3356_s1 = smov %s3355_s27  ;;  %s1415_s28 = scalar_lea.hbm %s3355_s27, %s3147_s4 }
 0x1ed   : > { %s1419_s16 = sshll.u32 %s1415_s28, 4  ;;  %s2483_s24 = scalar_lea.hbm %s3356_s1, 16  ;;  %s1420_s16 = int_to_ptr.hbm [resolvable:$true] %s1419_s16 }
 0x1ee   : > { %s2477_s6 = sshra.s32 %s1420_s16, 4  ;;  %s2478_s6 = int_to_ptr.hbm [resolvable:$true] %s2477_s6 }
 0x1ef   : > { %s2479_s10 = scalar_lea.hbm %s2478_s6, 8  ;;  %p2484_p5 = scmp.lt.s32.totalorder %s2478_s6, %s3356_s1 }
 0x1f0   : > { %p2480_p12 = scmp.ne.s32.totalorder %s2478_s6, %s2479_s10  ;;  %p2485_p6 = scmp.lt.s32.totalorder %s2483_s24, %s2479_s10 }
 0x1f2   : > { %p2481_p13 = pnand %p2480_p12, %p3017_p0  ;;  %p2486_p7 = por %p2485_p6, %p2484_p5 }
 0x1f4   : > { %p2482_p4 = pneg %p2481_p13 }
 0x1f6   : > { %p2487_p9 = pnand %p2486_p7, %p2482_p4 }
 0x1f8   : > { %2490 = shalt.err (!%p2487_p9)
}
 0x1f9   : > { %2028 = dma.vmem_to_hbm [thread:$0]  (%p3017_p0), %s1418_s29, 128, %s1420_s16, %s3157_s5  }
 0x1fa   : > { %s3357_s25 = sld [smem:[#allocation55_spill]]  ;;  %s1403_s3 = sshll.u32 %s745_s8, 4  ;;  %s1404_s3 = int_to_ptr.vmem [resolvable:$true] %s1403_s3 }
 0x1fb   : > { %s3359_s15 = sld [smem:[#allocation57_spill]]  ;;  %s1376_s1 = scalar_lea.sflag [#allocation6], %s3053_s18 }
 0x200   : > { %s3358_s19 = smov %s3357_s25  ;;  %s1401_s28 = scalar_lea.hbm %s3357_s25, %s3147_s4 }
 0x201   : > { %s1405_s10 = sshll.u32 %s1401_s28, 4  ;;  %s1429_s27 = scalar_lea.hbm %s3359_s15, %s3147_s4  ;;  %s1406_s10 = int_to_ptr.hbm [resolvable:$true] %s1405_s10 }
 0x202   : > { %s2505_s2 = sshra.s32 %s1406_s10, 4  ;;  %s2511_s17 = scalar_lea.hbm %s3358_s19, 16  ;;  %s2506_s2 = int_to_ptr.hbm [resolvable:$true] %s2505_s2 }
 0x203   : > { %s2507_s9 = scalar_lea.hbm %s2506_s2, 8  ;;  %p2512_p3 = scmp.lt.s32.totalorder %s2506_s2, %s3358_s19 }
 0x204   : > { %p2508_p10 = scmp.ne.s32.totalorder %s2506_s2, %s2507_s9  ;;  %p2513_p1 = scmp.lt.s32.totalorder %s2511_s17, %s2507_s9 }
 0x206   : > { %p2509_p11 = pnand %p2508_p10, %p3017_p0  ;;  %p2514_p12 = por %p2513_p1, %p2512_p3 }
 0x208   : > { %p2510_p2 = pneg %p2509_p11 }
 0x20a   : > { %p2515_p13 = pnand %p2514_p12, %p2510_p2 }
 0x20c   : > { %2518 = shalt.err (!%p2515_p13)
}
 0x20d   : > { %2027 = dma.vmem_to_hbm [thread:$0]  (%p3017_p0), %s1404_s3, 128, %s1406_s10, %s1376_s1  }
 0x20e   : > { %s3360_s25 = scalar_lea.vmem [#allocation22], %s3075_s14  ;;  %s1433_s6 = sshll.u32 %s1429_s27, 4  ;;  %s1434_s6 = int_to_ptr.hbm [resolvable:$true] %s1433_s6 }
 0x20f   : > { %s1431_s28 = sshll.u32 %s3360_s25, 4  ;;  %s2533_s24 = sshra.s32 %s1434_s6, 4  ;;  %s1432_s28 = int_to_ptr.vmem [resolvable:$true] %s1431_s28  ;;  %s2534_s24 = int_to_ptr.hbm [resolvable:$true] %s2533_s24 }
 0x210   : > { %s2535_s29 = scalar_lea.hbm %s2534_s24, 8  ;;  %s2539_s16 = scalar_lea.hbm %s3359_s15, 16 }
 0x211   : > { %p2536_p4 = scmp.ne.s32.totalorder %s2534_s24, %s2535_s29  ;;  %p2540_p7 = scmp.lt.s32.totalorder %s2534_s24, %s3359_s15 }
 0x212   : > { %p2541_p9 = scmp.lt.s32.totalorder %s2539_s16, %s2535_s29 }
 0x213   : > { %p2537_p5 = pnand %p2536_p4, %p3017_p0 }
 0x214   : > { %p2542_p10 = por %p2541_p9, %p2540_p7 }
 0x215   : > { %p2538_p6 = pneg %p2537_p5 }
 0x217   : > { %p2543_p11 = pnand %p2542_p10, %p2538_p6 }
 0x219   : > { %2546 = shalt.err (!%p2543_p11)
}
 0x21a   : > { %2029 = dma.vmem_to_hbm [thread:$0]  (%p3017_p0), %s1432_s28, 128, %s1434_s6, %s3157_s5  }
 0x21b   : > { %s3361_s10 = sld [smem:[#allocation58_spill]]  ;;  %s3362_s20 = scalar_lea.vmem [#allocation23], %s3075_s14 }
 0x21c   : > { %s1445_s25 = sshll.u32 %s3362_s20, 4  ;;  %s1391_s24 = scalar_lea.sflag [#allocation24], %s3053_s18  ;;  %s1446_s25 = int_to_ptr.vmem [resolvable:$true] %s1445_s25 }
 0x221   : > { %s1443_s27 = scalar_lea.hbm %s3361_s10, %s3147_s4  ;;  %s2567_s5 = scalar_lea.hbm %s3361_s10, 16 }
 0x222   : > { %s1447_s2 = sshll.u32 %s1443_s27, 4  ;;  %s1448_s2 = int_to_ptr.hbm [resolvable:$true] %s1447_s2 }
 0x223   : > { %s2561_s29 = sshra.s32 %s1448_s2, 4  ;;  %s2562_s29 = int_to_ptr.hbm [resolvable:$true] %s2561_s29 }
 0x224   : > { %s2563_s9 = scalar_lea.hbm %s2562_s29, 8  ;;  %p2568_p12 = scmp.lt.s32.totalorder %s2562_s29, %s3361_s10 }
 0x225   : > { %p2564_p2 = scmp.ne.s32.totalorder %s2562_s29, %s2563_s9  ;;  %p2569_p13 = scmp.lt.s32.totalorder %s2567_s5, %s2563_s9 }
 0x227   : > { %p2565_p3 = pnand %p2564_p2, %p3017_p0  ;;  %p2570_p4 = por %p2569_p13, %p2568_p12 }
 0x229   : > { %p2566_p1 = pneg %p2565_p3 }
 0x22b   : > { %p2571_p5 = pnand %p2570_p4, %p2566_p1 }
 0x22d   : > { %2574 = shalt.err (!%p2571_p5)
}
 0x22e   : > { %2030 = dma.vmem_to_hbm [thread:$0]  (%p3017_p0), %s1446_s25, 128, %s1448_s2, %s1391_s24  }
 0x22f PF: > { %p2090_p6 = scmp.ge.s32.totalorder %s2697_s0, 2  ;;  %s1459_s18 = sand.u32 1, %s2657_s21  }
 0x230   : > { %s1460_s14 = scalar_lea.sflag [#allocation6], %s1459_s18 }
 0x231   : > { %p2065_p7 = pnand %p2090_p6, %p3021_p8 }
 0x233   : > { %p2066_p9 = pneg %p2065_p7 }
 0x235   : > { %2644 = dma.done.wait (%p2066_p9), %s1460_s14, 128  }
 0x236   : > { %2646 = vsyncadd (%p2066_p9), %s1460_s14, 4294967168  ;;  %s3363_s4 = sadd.s32 4294967294, %s2697_s0  }
 0x237   : > { %s1469_s8 = sand.u32 1, %s3363_s4  }
 0x238   : > { %s1470_s1 = scalar_lea.sflag [#allocation21], %s1469_s8 }
 0x239   : > { %2648 = dma.done.wait (%p2066_p9), %s1470_s1, 256  }
 0x23a   : > { %2650 = vsyncadd (%p2066_p9), %s1470_s1, 4294967040  ;;  %s1490_s7 = scalar_lea.sflag [#allocation24], %s1459_s18 }
 0x23b   : > { %2652 = dma.done.wait (%p2066_p9), %s1490_s7, 128  }
 0x23c   : > { %2654 = vsyncadd (%p2066_p9), %s1490_s7, 4294967168  ;;  %s45_s0 = sadd.s32 1, %s2697_s0   ;;  %s3364_s24 = sld [smem:[#allocation34_spill]] }
 0x23d   : > { %p42_p0 = scmp.ge.s32.totalorder %s45_s0, 6   ;;  %s3365_s13 = sld [smem:[#allocation42_spill]] }
 0x23e   : > { %s3366_s27 = sld [smem:[#allocation37_spill]]  ;;  %s3369_s21 = smov %s2661_s22 }
 0x23f   : > { %s3367_s29 = sld [smem:[#allocation39_spill]]  ;;  %s3370_s22 = smov %s2665_s23 }
 0x240   : > { %s3368_s3 = sld [smem:[#allocation40_spill]]  ;;  %s3371_s23 = smov %s2997_s12 }
 0x241   : > { %s3372_s25 = smov %s2677_s26  ;;  %s3374_s28 = smov %s2693_s30 }
 0x242   :  { %44 = sbr.rel (!%p42_p0) target bundleno = 35 (0x23), region = 222 }
 0x243   : > { %s3373_s26 = smov %s3365_s13 }
 0x246   : > { %s3375_s30 = smov %s3368_s3 }
 0x247   :  { %1496 = vsyncpa [#allocation5], 1 }
 0x248   :  { %1498 = vsyncpa [#allocation5 + $0x1], 1 }
 0x249   :  { %1499 = vsyncpa [#allocation8], 1 }
 0x24a   :  { %1501 = vsyncpa [#allocation8 + $0x1], 1 }
 0x24b   :  { %1502 = vsyncpa [#allocation11], 1 }
 0x24c   :  { %1503 = vsyncpa [#allocation14], 1 }
 0x24d   :  { %1504 = vsyncpa [#allocation17], 1 }
 0x24e   :  { %1505 = vsyncpa [#allocation6], 1 }
 0x24f   :  { %1507 = vsyncpa [#allocation6 + $0x1], 1 }
 0x250   :  { %1508 = vsyncpa [#allocation21], 1 }
 0x251   :  { %1510 = vsyncpa [#allocation21 + $0x1], 1 }
 0x252   :  { %1511 = vsyncpa [#allocation24], 1 }
 0x253   :  { %1513 = vsyncpa [#allocation24 + $0x1], 1 }

</bundles_post_ra>
